<compile_context>
chip_gen: v7x
topology: tpu7x:2x2x1
jax: 0.10.0
libtpu: 0.0.40
codegen_flags: <defaults>
</compile_context>

<pallas_src>
import jax
import jax.numpy as jnp
from jax.experimental import pallas as pl
from jax.experimental.pallas import tpu as pltpu

FIELD_DIMS = (10, 20, 30)   # three categorical fields
EMBED_DIM = 16
BATCH = 8

F = len(FIELD_DIMS)
V = sum(FIELD_DIMS)          # 60 rows in the shared wide table
D_IN = F * EMBED_DIM         # 48
H1, H2 = 64, 32

LANE = 128                   # pad everything to full lane width
VP, DP, H1P, H2P = LANE, LANE, LANE, LANE
WIDE_COL = H1                # spare fused-layer-1 column carrying the wide sum (+ b3)

# per-field offsets into the concatenated/block-diagonal table
_OFFSETS = []
_acc = 0
for _fd in FIELD_DIMS:
    _OFFSETS.append(_acc)
    _acc += _fd

assert V <= VP, "packed embedding table must fit within 128 lanes"
assert D_IN <= DP and H1 < H1P and H2 <= H2P


def wnd_kernel(x_ref, fw1_ref, b1_ref, w2_ref, b2_ref, w3_ref, wsel_ref, out_ref):
    tile_b = x_ref.shape[0]
    lane_ids = jax.lax.broadcasted_iota(jnp.int32, (tile_b, VP), 1)

    # Multi-hot over (already offset) indices: one compare per field, int32 accumulate,
    # single cast to bf16.
    m = (lane_ids == x_ref[:, 0:1]).astype(jnp.int32)
    for i in range(1, F):
        m = m + (lane_ids == x_ref[:, i:i + 1]).astype(jnp.int32)
    m_bf = m.astype(jnp.bfloat16)

    # Fused gather + Linear1 in one MXU matmul; column WIDE_COL of fw1 holds the
    # wide EmbeddingBag weights (and its bias holds b3), so h1[:, WIDE_COL] is the
    # wide part + b3 before the ReLU.
    h1 = jnp.dot(m_bf, fw1_ref[...],
                 preferred_element_type=jnp.float32) + b1_ref[...]     # (tile_b, H1P)
    h = jnp.maximum(h1, 0.0)
    h = jnp.dot(h.astype(jnp.bfloat16), w2_ref[...],
                preferred_element_type=jnp.float32) + b2_ref[...]      # (tile_b, H2P)
    h = jnp.maximum(h, 0.0)

    # Final Linear(32,1): N=1, kept off the MXU.  The wide (+ b3) column of h1 is
    # merged into the SAME single 128-lane reduction via the one-hot wsel row.
    out = jnp.sum(h * w3_ref[...] + h1 * wsel_ref[...], axis=-1)       # (tile_b,) f32
    out_ref[...] = out.reshape(1, tile_b)                              # lane-dense store


def pack_params(params):
    """Pad / transpose / fold / cast PyTorch-shaped params into kernel layout."""
    f32, bf16 = jnp.float32, jnp.bfloat16

    # block-diagonal embedding table and padded W1, both f32
    table = jnp.zeros((VP, DP), f32)
    for i, fd in enumerate(FIELD_DIMS):
        table = table.at[_OFFSETS[i]:_OFFSETS[i] + fd,
                         i * EMBED_DIM:(i + 1) * EMBED_DIM].set(params["embed"][i])
    w1 = jnp.zeros((DP, H1P), f32).at[:D_IN, :H1].set(params["w1"])

    # exact fold (no nonlinearity between gather and Linear1), done in f32
    fw1 = table @ w1                                                    # (VP, H1P)

    # fold the wide EmbeddingBag (raw indices) into spare output column WIDE_COL:
    # row (off_i + j) gets wide_weight[j], so raw-index collisions across fields
    # still accumulate exactly like torch's EmbeddingBag(mode='sum').
    wide_col = jnp.zeros((VP,), f32)
    for i, fd in enumerate(FIELD_DIMS):
        wide_col = wide_col.at[_OFFSETS[i]:_OFFSETS[i] + fd].set(
            params["wide_weight"][:fd, 0])
    fw1 = fw1.at[:, WIDE_COL].set(wide_col)

    b1 = jnp.zeros((1, H1P), f32).at[0, :H1].set(params["b1"][0])
    b1 = b1.at[0, WIDE_COL].set(params["b3"][0, 0])     # fold b3 into the wide column

    w2 = jnp.zeros((H1P, H2P), f32).at[:H1, :H2].set(params["w2"])  # rows >= H1 stay 0
    b2 = jnp.zeros((1, H2P), f32).at[0, :H2].set(params["b2"][0])
    w3 = jnp.zeros((1, H2P), f32).at[0, :H2].set(params["w3"][:, 0])
    wsel = jnp.zeros((1, H1P), f32).at[0, WIDE_COL].set(1.0)

    return {
        "fw1": fw1.astype(bf16), "b1": b1,
        "w2": w2.astype(bf16), "b2": b2,
        "w3": w3, "wsel": wsel,
    }


def wide_and_deep_forward(kparams, x, *, tile_b=512):
    """x: (B, F) int indices; returns (B,) float32 — matches output.squeeze(1)."""
    B, f = x.shape
    assert f == F
    # Cap the tile so the grid has >= 2 steps when the batch allows it (lets the
    # "parallel" axis shard across v7x's two TensorCores); keep a multiple of 8.
    half8 = ((B + 1) // 2 + 7) // 8 * 8
    tile_b = int(max(8, min(tile_b, half8)))
    num_tiles = pl.cdiv(B, tile_b)
    b_pad = num_tiles * tile_b

    # pre-add field offsets so the kernel needs only one compare per field
    offsets = jnp.asarray(_OFFSETS, jnp.int32)[None, :]
    x_pad = jnp.zeros((b_pad, F), jnp.int32).at[:B, :].set(x.astype(jnp.int32) + offsets)

    def resident(arr):
        return pl.BlockSpec(arr.shape, lambda i: (0, 0))   # stays in VMEM across grid

    kp = kparams
    out = pl.pallas_call(
        wnd_kernel,
        out_shape=jax.ShapeDtypeStruct((num_tiles, tile_b), jnp.float32),
        grid=(num_tiles,),
        in_specs=[
            pl.BlockSpec((tile_b, F), lambda i: (i, 0)),    # index tile per grid step
            resident(kp["fw1"]), resident(kp["b1"]),
            resident(kp["w2"]), resident(kp["b2"]),
            resident(kp["w3"]), resident(kp["wsel"]),
        ],
        out_specs=pl.BlockSpec((1, tile_b), lambda i: (i, 0)),
        compiler_params=pltpu.CompilerParams(
            dimension_semantics=("parallel",)),
        # NOTE: only if sweeping tile_b >= ~8K rows on v5e, also pass
        # vmem_limit_bytes (v5e scoped-VMEM default is 16 MiB); not needed here.
    )(x_pad, kp["fw1"], kp["b1"], kp["w2"], kp["b2"], kp["w3"], kp["wsel"])

    return out.reshape(b_pad)[:B]


def init_params(key):
    """Deterministic synthetic parameters with the same shapes as the torch module."""
    total = sum(FIELD_DIMS)
    d_in = F * EMBED_DIM
    ks = jax.random.split(key, 8)
    params = {
        "wide_weight": 0.1 * jax.random.normal(ks[0], (total, 1), jnp.float32),
        "embed": [
            0.1 * jax.random.normal(jax.random.fold_in(ks[1], i),
                                    (FIELD_DIMS[i], EMBED_DIM), jnp.float32)
            for i in range(F)
        ],
        "w1": jax.random.normal(ks[2], (d_in, 64), jnp.float32) / jnp.sqrt(float(d_in)),
        "b1": 0.01 * jax.random.normal(ks[3], (1, 64), jnp.float32),
        "w2": jax.random.normal(ks[4], (64, 32), jnp.float32) / 8.0,
        "b2": 0.01 * jax.random.normal(ks[5], (1, 32), jnp.float32),
        "w3": jax.random.normal(ks[6], (32, 1), jnp.float32) / jnp.sqrt(32.0),
        "b3": 0.01 * jax.random.normal(ks[7], (1, 1), jnp.float32),
    }
    return params


def reference_forward(params, x):
    """Pure-JAX f32 mirror of the PyTorch forward, for correctness checking."""
    wide = jnp.sum(params["wide_weight"][x, 0], axis=1, keepdims=True)
    embeds = [params["embed"][i][x[:, i]] for i in range(x.shape[1])]
    deep = jnp.concatenate(embeds, axis=1)
    h = jnp.maximum(deep @ params["w1"] + params["b1"], 0.0)
    h = jnp.maximum(h @ params["w2"] + params["b2"], 0.0)
    h = h @ params["w3"] + params["b3"]
    return (wide + h)[:, 0]


if __name__ == "__main__":
    key = jax.random.PRNGKey(0)
    pk, xk = jax.random.split(key)
    params = init_params(pk)
    kparams = pack_params(params)

    # indices valid both for the per-field embedding tables and the shared wide
    # table (which has sum(field_dims) >= field_dims[i] rows), as in the module.
    cols = [
        jax.random.randint(jax.random.fold_in(xk, i), (BATCH,), 0, fd, jnp.int32)
        for i, fd in enumerate(FIELD_DIMS)
    ]
    x = jnp.stack(cols, axis=1)   # (B, F)

    out = wide_and_deep_forward(kparams, x)
    out = jax.block_until_ready(out)

    ref = reference_forward(params, x)
    assert out.shape == (BATCH,), out.shape
    # bf16 weights/activations with f32 accumulation -> loosened tolerance.
    assert jnp.allclose(out, ref, atol=2e-2, rtol=2e-2), (out, ref)
    print("KERNEL_OK")
</pallas_src>

<mosaic_0001>
module attributes {stable_mosaic.version = 11 : i64} {
  func.func @wnd_kernel(%arg0: i32, %arg1: memref<8x3xi32, #tpu.memory_space<vmem>>, %arg2: memref<128x128xbf16, #tpu.memory_space<vmem>>, %arg3: memref<1x128xf32, #tpu.memory_space<vmem>>, %arg4: memref<128x128xbf16, #tpu.memory_space<vmem>>, %arg5: memref<1x128xf32, #tpu.memory_space<vmem>>, %arg6: memref<1x128xf32, #tpu.memory_space<vmem>>, %arg7: memref<1x128xf32, #tpu.memory_space<vmem>>, %arg8: memref<1x8xf32, #tpu.memory_space<vmem>>) attributes {dimension_semantics = [#tpu.dimension_semantics<parallel>], iteration_bounds = array<i64: 1>, scalar_prefetch = 0 : i64, scratch_operands = 0 : i64, tpu.core_type = #tpu.core_type<tc>, window_params = [{transform_indices = @transform_0, window_bounds = array<i64: 8, 3>}, {pipeline_mode = #tpu.pipeline_mode<synchronous>, transform_indices = @transform_1, window_bounds = array<i64: 128, 128>}, {pipeline_mode = #tpu.pipeline_mode<synchronous>, transform_indices = @transform_2, window_bounds = array<i64: 1, 128>}, {pipeline_mode = #tpu.pipeline_mode<synchronous>, transform_indices = @transform_3, window_bounds = array<i64: 128, 128>}, {pipeline_mode = #tpu.pipeline_mode<synchronous>, transform_indices = @transform_4, window_bounds = array<i64: 1, 128>}, {pipeline_mode = #tpu.pipeline_mode<synchronous>, transform_indices = @transform_5, window_bounds = array<i64: 1, 128>}, {pipeline_mode = #tpu.pipeline_mode<synchronous>, transform_indices = @transform_6, window_bounds = array<i64: 1, 128>}, {transform_indices = @transform_7, window_bounds = array<i64: 1, 8>}]} {
    %0 = tpu.iota {dimensions = array<i32: 1>} : vector<8x128xi32>
    %c0 = arith.constant 0 : index
    %c0_0 = arith.constant 0 : index
    %1 = vector.load %arg1[%c0, %c0_0] : memref<8x3xi32, #tpu.memory_space<vmem>>, vector<8x1xi32>
    %2 = vector.broadcast %1 : vector<8x1xi32> to vector<8x128xi32>
    %3 = arith.cmpi eq, %0, %2 : vector<8x128xi32>
    %4 = arith.extui %3 : vector<8x128xi1> to vector<8x128xi32>
    %c0_1 = arith.constant 0 : index
    %c1 = arith.constant 1 : index
    %5 = vector.load %arg1[%c0_1, %c1] : memref<8x3xi32, #tpu.memory_space<vmem>>, vector<8x1xi32>
    %6 = vector.broadcast %5 : vector<8x1xi32> to vector<8x128xi32>
    %7 = arith.cmpi eq, %0, %6 : vector<8x128xi32>
    %8 = arith.extui %7 : vector<8x128xi1> to vector<8x128xi32>
    %9 = arith.addi %4, %8 : vector<8x128xi32>
    %c0_2 = arith.constant 0 : index
    %c2 = arith.constant 2 : index
    %10 = vector.load %arg1[%c0_2, %c2] : memref<8x3xi32, #tpu.memory_space<vmem>>, vector<8x1xi32>
    %11 = vector.broadcast %10 : vector<8x1xi32> to vector<8x128xi32>
    %12 = arith.cmpi eq, %0, %11 : vector<8x128xi32>
    %13 = arith.extui %12 : vector<8x128xi1> to vector<8x128xi32>
    %14 = arith.addi %9, %13 : vector<8x128xi32>
    %15 = arith.sitofp %14 : vector<8x128xi32> to vector<8x128xbf16>
    %c0_3 = arith.constant 0 : index
    %c0_4 = arith.constant 0 : index
    %16 = vector.load %arg2[%c0_3, %c0_4] : memref<128x128xbf16, #tpu.memory_space<vmem>>, vector<128x128xbf16>
    %cst = arith.constant dense<0.000000e+00> : vector<8x128xf32>
    %17 = tpu.matmul %15, %16, %cst {dimension_numbers = #tpu.dot_dimension_numbers<[1], [0], [0], [1], [0, 0, 1, 1], [], []>} : vector<8x128xbf16>, vector<128x128xbf16>, vector<8x128xf32> -> vector<8x128xf32>
    %c0_5 = arith.constant 0 : index
    %c0_6 = arith.constant 0 : index
    %18 = vector.load %arg3[%c0_5, %c0_6] : memref<1x128xf32, #tpu.memory_space<vmem>>, vector<1x128xf32>
    %19 = vector.broadcast %18 : vector<1x128xf32> to vector<8x128xf32>
    %20 = arith.addf %17, %19 : vector<8x128xf32>
    %cst_7 = arith.constant 0.000000e+00 : f32
    %21 = vector.broadcast %cst_7 : f32 to vector<8x128xf32>
    %22 = arith.maximumf %20, %21 : vector<8x128xf32>
    %23 = arith.truncf %22 : vector<8x128xf32> to vector<8x128xbf16>
    %c0_8 = arith.constant 0 : index
    %c0_9 = arith.constant 0 : index
    %24 = vector.load %arg4[%c0_8, %c0_9] : memref<128x128xbf16, #tpu.memory_space<vmem>>, vector<128x128xbf16>
    %cst_10 = arith.constant dense<0.000000e+00> : vector<8x128xf32>
    %25 = tpu.matmul %23, %24, %cst_10 {dimension_numbers = #tpu.dot_dimension_numbers<[1], [0], [0], [1], [0, 0, 1, 1], [], []>} : vector<8x128xbf16>, vector<128x128xbf16>, vector<8x128xf32> -> vector<8x128xf32>
    %c0_11 = arith.constant 0 : index
    %c0_12 = arith.constant 0 : index
    %26 = vector.load %arg5[%c0_11, %c0_12] : memref<1x128xf32, #tpu.memory_space<vmem>>, vector<1x128xf32>
    %27 = vector.broadcast %26 : vector<1x128xf32> to vector<8x128xf32>
    %28 = arith.addf %25, %27 : vector<8x128xf32>
    %cst_13 = arith.constant 0.000000e+00 : f32
    %29 = vector.broadcast %cst_13 : f32 to vector<8x128xf32>
    %30 = arith.maximumf %28, %29 : vector<8x128xf32>
    %c0_14 = arith.constant 0 : index
    %c0_15 = arith.constant 0 : index
    %31 = vector.load %arg6[%c0_14, %c0_15] : memref<1x128xf32, #tpu.memory_space<vmem>>, vector<1x128xf32>
    %32 = vector.broadcast %31 : vector<1x128xf32> to vector<8x128xf32>
    %33 = arith.mulf %30, %32 : vector<8x128xf32>
    %c0_16 = arith.constant 0 : index
    %c0_17 = arith.constant 0 : index
    %34 = vector.load %arg7[%c0_16, %c0_17] : memref<1x128xf32, #tpu.memory_space<vmem>>, vector<1x128xf32>
    %35 = vector.broadcast %34 : vector<1x128xf32> to vector<8x128xf32>
    %36 = arith.mulf %20, %35 : vector<8x128xf32>
    %37 = arith.addf %33, %36 : vector<8x128xf32>
    %cst_18 = arith.constant dense<0.000000e+00> : vector<8xf32>
    %38 = vector.multi_reduction <add>, %37, %cst_18 [1] : vector<8x128xf32> to vector<8xf32>
    %39 = vector.shape_cast %38 : vector<8xf32> to vector<1x8xf32>
    %c0_19 = arith.constant 0 : index
    %c0_20 = arith.constant 0 : index
    %40 = vector.load %arg8[%c0_19, %c0_20] : memref<1x8xf32, #tpu.memory_space<vmem>>, vector<1x8xf32>
    tpu.vector_store %arg8[%c0_19, %c0_20], %39 {strides = array<i32>} : memref<1x8xf32, #tpu.memory_space<vmem>>, vector<1x8xf32>,
    return
  }
  func.func @transform_0(%arg0: i32) -> (i32, i32) {
    %c0_i32 = arith.constant 0 : i32
    %c0_i32_0 = arith.constant 0 : i32
    return %arg0, %c0_i32 : i32, i32
  }
  func.func @transform_1(%arg0: i32) -> (i32, i32) {
    %c0_i32 = arith.constant 0 : i32
    %c0_i32_0 = arith.constant 0 : i32
    %c0_i32_1 = arith.constant 0 : i32
    return %c0_i32, %c0_i32_0 : i32, i32
  }
  func.func @transform_2(%arg0: i32) -> (i32, i32) {
    %c0_i32 = arith.constant 0 : i32
    %c0_i32_0 = arith.constant 0 : i32
    %c0_i32_1 = arith.constant 0 : i32
    return %c0_i32, %c0_i32_0 : i32, i32
  }
  func.func @transform_3(%arg0: i32) -> (i32, i32) {
    %c0_i32 = arith.constant 0 : i32
    %c0_i32_0 = arith.constant 0 : i32
    %c0_i32_1 = arith.constant 0 : i32
    return %c0_i32, %c0_i32_0 : i32, i32
  }
  func.func @transform_4(%arg0: i32) -> (i32, i32) {
    %c0_i32 = arith.constant 0 : i32
    %c0_i32_0 = arith.constant 0 : i32
    %c0_i32_1 = arith.constant 0 : i32
    return %c0_i32, %c0_i32_0 : i32, i32
  }
  func.func @transform_5(%arg0: i32) -> (i32, i32) {
    %c0_i32 = arith.constant 0 : i32
    %c0_i32_0 = arith.constant 0 : i32
    %c0_i32_1 = arith.constant 0 : i32
    return %c0_i32, %c0_i32_0 : i32, i32
  }
  func.func @transform_6(%arg0: i32) -> (i32, i32) {
    %c0_i32 = arith.constant 0 : i32
    %c0_i32_0 = arith.constant 0 : i32
    %c0_i32_1 = arith.constant 0 : i32
    return %c0_i32, %c0_i32_0 : i32, i32
  }
  func.func @transform_7(%arg0: i32) -> (i32, i32) {
    %c0_i32 = arith.constant 0 : i32
    %c0_i32_0 = arith.constant 0 : i32
    return %arg0, %c0_i32 : i32, i32
  }
}

</mosaic_0001>

<bundles_post_ra>
// kernel: tpu_custom_call.1
= control target key start
LH: loop header
LB: loop body
LE: loop exit
PB: predicated region body
PF: predicated region fallthrough
CT: control target
= control target key end

     0   :  { %12 = vsyncpa [#allocation3], 0  ;;  %s649_s0 = inlined_call_operand.vmem [shape: s32[8,3], index: 0, kind: input, shape index: {}]   ;;  %s650_s1 = inlined_call_operand.hbm [shape: bf16[128,128], index: 1, kind: input, shape index: {}]   ;;  %s651_s2 = inlined_call_operand.vmem [shape: f32[1,128], index: 2, kind: input, shape index: {}]   ;;  %s652_s3 = inlined_call_operand.hbm [shape: bf16[128,128], index: 3, kind: input, shape index: {}]   ;;  %s653_s4 = inlined_call_operand.vmem [shape: f32[1,128], index: 4, kind: input, shape index: {}]   ;;  %s654_s5 = inlined_call_operand.vmem [shape: f32[1,128], index: 5, kind: input, shape index: {}]   ;;  %s655_s6 = inlined_call_operand.vmem [shape: f32[1,128], index: 6, kind: input, shape index: {}]   ;;  %s656_s7 = inlined_call_operand.hbm [shape: f32[1,8], index: 7, kind: output, shape index: {}]  }
   0x1   :  { %13 = vsyncpa [#allocation6], 0 }
   0x2   :  { %14 = vsyncpa [#allocation4], 0  ;;  %s526_s24 = smov [#allocation2]   ;;  %s454_s28 = scalar_lea.hbm %s650_s1, 1024 }
   0x3   :  { %s22_s25 = sshll.u32 %s526_s24, 4  ;;  %p455_p0 = scmp.ne.s32.totalorder %s650_s1, %s454_s28  ;;  %s23_s25 = int_to_ptr.vmem [resolvable:$true] %s22_s25 }
   0x4   :  { %p458_p1 = scmp.lt.u32.totalorder %s454_s28, %s650_s1 }
   0x6   :  { %p460_p2 = pnand %p458_p1, %p455_p0 }
   0x8   :  { %463 = shalt.err (!%p460_p2)
}
   0x9   :  { %s464_s10 = scalar_lea.vmem %s23_s25, 1024  ;;  %p469_p4 = scmp.lt.s32.totalorder %s23_s25, %s23_s25 }
   0xa   :  { %p465_p3 = scmp.ne.s32.totalorder %s23_s25, %s464_s10  ;;  %p470_p5 = scmp.lt.s32.totalorder %s464_s10, %s464_s10 }
   0xc   :  { %p471_p6 = por %p470_p5, %p469_p4 }
   0xe   :  { %p472_p7 = pnand %p471_p6, %p465_p3 }
  0x10   :  { %475 = shalt.err (!%p472_p7)
}
  0x11   :  { %s527_s11 = smov 64   ;;  %s528_s12 = smov 4  }
  0x12   :  { %28 = dma.hbm_to_vmem [thread:$0]  %s650_s1, 1024, %s23_s25, [#allocation3], %s527_s11, %s527_s11, %s528_s12  }
  0x13   :  { %s529_s15 = smov [#allocation5]   ;;  %s476_s19 = scalar_lea.hbm %s652_s3, 1024 }
  0x14   :  { %s36_s16 = sshll.u32 %s529_s15, 4  ;;  %p477_p8 = scmp.ne.s32.totalorder %s652_s3, %s476_s19  ;;  %s37_s16 = int_to_ptr.vmem [resolvable:$true] %s36_s16 }
  0x15   :  { %p480_p9 = scmp.lt.u32.totalorder %s476_s19, %s652_s3 }
  0x17   :  { %p482_p10 = pnand %p480_p9, %p477_p8 }
  0x19   :  { %485 = shalt.err (!%p482_p10)
}
  0x1a   :  { %s486_s24 = scalar_lea.vmem %s37_s16, 1024  ;;  %p491_p12 = scmp.lt.s32.totalorder %s37_s16, %s37_s16 }
  0x1b   :  { %p487_p11 = scmp.ne.s32.totalorder %s37_s16, %s486_s24  ;;  %p492_p13 = scmp.lt.s32.totalorder %s486_s24, %s486_s24 }
  0x1d   :  { %p493_p0 = por %p492_p13, %p491_p12 }
  0x1f   :  { %p494_p1 = pnand %p493_p0, %p487_p11 }
  0x21   :  { %497 = shalt.err (!%p494_p1)
}
  0x22   :  { %42 = dma.hbm_to_vmem [thread:$0]  %s652_s3, 1024, %s37_s16, [#allocation6], %s527_s11, %s527_s11, %s528_s12  }
  0x23   :  { %520 = dma.done.wait [#allocation3], 1024  }
  0x24   :  { %521 = vsyncadd [#allocation3], 4294966272 }
  0x25   :  { %522 = dma.done.wait [#allocation6], 1024  }
  0x26   :  { %523 = vsyncadd [#allocation6], 4294966272  ;;  %v530_v0 = vmov 0   ;;  %v531_v1 = vmov 2   ;;  %v532_v2 = vmov 0.0   ;;  %v58_v3 = vld [vmem:[%s649_s0] sm:$0xff]  ;;  %v56_v19 = vlaneseq }
  0x27   :  { %434 = vset.pattern.permute.xlu0 %v530_v0  ;;  %436 = vset.pattern.permute.xlu1 %v531_v1  ;;  %v438_v4 = vld [vmem:[#allocation2] sm:$0xff]   ;;  %v439_v5 = vld [vmem:[#allocation2 + $0x8] sm:$0xff]   ;;  %v533_v6 = vmov 1   ;;  %v440_v7 = vld [vmem:[#allocation2 + $0x10] sm:$0xff]   ;;  %vm534_vm0 = vmmov 0   ;;  %vm328_vm4 = vcmask 57344  }
  0x28   :  { %384 = vmatprep.subr.bf16.mxu0 %v532_v2  ;;  %404 = vmatprep.subr.bf16.mxu1 %v532_v2  ;;  %v441_v8 = vld [vmem:[#allocation2 + $0x18] sm:$0xff]   ;;  %v442_v9 = vld [vmem:[#allocation2 + $0x20] sm:$0xff]   ;;  %v447_v11 = vld [vmem:[#allocation5 + $0x8] sm:$0xff]   ;;  %v57_v20 = vand.u32 127, %v56_v19  ;;  %v324_v53 = vshrl.u32 %v56_v19, 7 }
  0x29   :  { %60 = vperm.xlu0 %434, %v58_v3   ;;  %71 = vperm.xlu1 %436, %v58_v3   ;;  %v446_v10 = vld [vmem:[#allocation5] sm:$0xff]   ;;  %v443_v12 = vld [vmem:[#allocation2 + $0x28] sm:$0xff]   ;;  %v448_v13 = vld [vmem:[#allocation5 + $0x10] sm:$0xff]  }
  0x2a   :  { %385 = vmatpush3.bf16.msra.mxu0 %v438_v4  ;;  %400 = vmatprep.mubr.msk.bf16.mxu0 %vm534_vm0, %v532_v2  ;;  %v444_v14 = vld [vmem:[#allocation2 + $0x30] sm:$0xff]   ;;  %v449_v15 = vld [vmem:[#allocation5 + $0x18] sm:$0xff]   ;;  %v450_v17 = vld [vmem:[#allocation5 + $0x20] sm:$0xff]   ;;  %v325_v54 = vsub.s32 %v57_v20, %v324_v53 }
  0x2b   :  { %386 = vmatprep.subr.bf16.mxu0 %v532_v2  ;;  %420 = vmatprep.mubr.msk.bf16.mxu1 %vm534_vm0, %v532_v2  ;;  %v445_v16 = vld [vmem:[#allocation2 + $0x38] sm:$0xff]   ;;  %v451_v18 = vld [vmem:[#allocation5 + $0x28] sm:$0xff]   ;;  %v452_v31 = vld [vmem:[#allocation5 + $0x30] sm:$0xff]  }
  0x2c   :  { %405 = vmatpush3.bf16.msra.mxu1 %v446_v10  ;;  %v453_v32 = vld [vmem:[#allocation5 + $0x38] sm:$0xff]   ;;  %v346_v33 = vld [vmem:[%s651_s2] ss:$0 sm:$0xff] }
  0x2d   :  { %435 = vset.pattern.permute.xlu0 %v533_v6  ;;  %406 = vmatprep.subr.bf16.mxu1 %v532_v2  ;;  %v355_v41 = vld [vmem:[%s653_s4] ss:$0 sm:$0xff]  ;;  %s535_s4 = smov [#allocation7]  }
  0x2e   :  { %65 = vperm.xlu0 %435, %v58_v3   ;;  %387 = vmatpush3.bf16.msra.mxu0 %v439_v5  ;;  %v365_v45 = vld [vmem:[%s655_s6] ss:$0 sm:$0xff]  ;;  %s336_s10 = sshll.u32 %s535_s4, 4  ;;  %s337_s10 = int_to_ptr.vmem [resolvable:$true] %s336_s10 }
  0x2f   :  { %388 = vmatprep.subr.bf16.mxu0 %v532_v2  ;;  %v364_v46 = vld [vmem:[%s654_s5] ss:$0 sm:$0xff]  ;;  %s498_s6 = scalar_lea.vmem %s337_s10, 16  ;;  %s502_s11 = scalar_lea.vmem %s337_s10, 32 }
  0x30   :  { %407 = vmatpush3.bf16.msra.mxu1 %v447_v11  ;;  %p499_p2 = scmp.ne.s32.totalorder %s337_s10, %s498_s6  ;;  %p503_p3 = scmp.lt.s32.totalorder %s337_s10, %s337_s10 }
  0x31   :  { %408 = vmatprep.subr.bf16.mxu1 %v532_v2  ;;  %p504_p4 = scmp.lt.s32.totalorder %s502_s11, %s498_s6 }
  0x32   :  { %437 = vset.pattern.permute.xlu0 %v531_v1  ;;  %389 = vmatpush3.bf16.msra.mxu0 %v440_v7 }
  0x33   :  { %390 = vmatprep.subr.bf16.mxu0 %v532_v2  ;;  %p505_p5 = por %p504_p4, %p503_p3 }
  0x34   :  { %409 = vmatpush3.bf16.msra.mxu1 %v448_v13 }
  0x35   :  { %410 = vmatprep.subr.bf16.mxu1 %v532_v2  ;;  %p506_p6 = pnand %p505_p5, %p499_p2 }
  0x36   :  { %391 = vmatpush3.bf16.msra.mxu0 %v441_v8 }
  0x37   :  { %392 = vmatprep.subr.bf16.mxu0 %v532_v2 }
  0x38   :  { %411 = vmatpush3.bf16.msra.mxu1 %v449_v15 }
  0x39   :  { %412 = vmatprep.subr.bf16.mxu1 %v532_v2 }
  0x3a   :  { %393 = vmatpush3.bf16.msra.mxu0 %v442_v9 }
  0x3b   :  { %394 = vmatprep.subr.bf16.mxu0 %v532_v2 }
  0x3c   :  { %413 = vmatpush3.bf16.msra.mxu1 %v450_v17 }
  0x3d   :  { %414 = vmatprep.subr.bf16.mxu1 %v532_v2 }
  0x3e   :  { %395 = vmatpush3.bf16.msra.mxu0 %v443_v12 }
  0x3f   :  { %396 = vmatprep.subr.bf16.mxu0 %v532_v2 }
  0x40   :  { %415 = vmatpush3.bf16.msra.mxu1 %v451_v18 }
  0x41   :  { %416 = vmatprep.subr.bf16.mxu1 %v532_v2 }
  0x42   :  { %397 = vmatpush3.bf16.msra.mxu0 %v444_v14 }
  0x43   :  { %398 = vmatprep.subr.bf16.mxu0 %v532_v2 }
  0x44   :  { %417 = vmatpush3.bf16.msra.mxu1 %v452_v31 }
  0x45   :  { %418 = vmatprep.subr.bf16.mxu1 %v532_v2 }
  0x46   :  { %399 = vmatpush3.bf16.msra.mxu0 %v445_v16 }
  0x48   :  { %419 = vmatpush3.bf16.msra.mxu1 %v453_v32 }
  0xa8   :  { %v61_v21 = vpop.permute.xlu0 %60  ;;  %v72_v22 = vpop.permute.xlu1 %71 }
  0xa9   :  { %vm62_vm1 = vcmp.eq.s32.totalorder %v57_v20, %v61_v21  ;;  %vm73_vm2 = vcmp.eq.s32.totalorder %v57_v20, %v72_v22 }
  0xaa   :  { %v63_v24 = vsel %vm62_vm1, 1, %v530_v0  ;;  %v74_v26 = vsel %vm73_vm2, 1, %v530_v0 }
  0xad   :  { %v66_v23 = vpop.permute.xlu0 %65 }
  0xae   :  { %vm67_vm3 = vcmp.eq.s32.totalorder %v57_v20, %v66_v23 }
  0xaf   :  { %v68_v25 = vsel %vm67_vm3, 1, %v530_v0 }
  0xb0   :  { %v69_v27 = vadd.s32 %v68_v25, %v63_v24 }
  0xb2   :  { %v75_v28 = vadd.s32 %v74_v26, %v69_v27 }
  0xb4   :  { %v76_v29 = vcvt.s32.f32 %v75_v28 }
  0xb6   :  { %v77_v30 = vpack.c.bf16 %v76_v29, %v76_v29 }
  0xb8   :  { %401 = vmatmul.mubr.bf16.vlgmr.msra.gmra.mrb[0].mxu0 %v77_v30 }
 0x18b   :  { %v183_v34 = vpop.f32.mrb[0].mxu0 }
 0x18c   :  { %v184_v35 = vadd.f32 %v346_v33, %v183_v34  ;;  %v402_v36 = vpop.f32.mrb[1].mxu0 }
 0x18d   :  { %v186_v37 = vpop.f32.mrb[2].mxu0 }
 0x18e   :  { %v189_v38 = vmax.f32 %v184_v35, 0.0  ;;  %v403_v39 = vpop.f32.mrb[3].mxu0  ;;  %v318_v50 = vmul.f32 %v365_v45, %v184_v35 }
 0x190   :  { %v190_v40 = vpack.c.bf16 %v189_v38, %v189_v38 }
 0x192   :  { %421 = vmatmul.mubr.bf16.vlgmr.msra.gmra.mrb[0].mxu1 %v190_v40 }
 0x265   :  { %v296_v42 = vpop.f32.mrb[0].mxu1 }
 0x266   :  { %v297_v43 = vadd.f32 %v355_v41, %v296_v42  ;;  %v422_v44 = vpop.f32.mrb[1].mxu1 }
 0x267   :  { %v299_v47 = vpop.f32.mrb[2].mxu1 }
 0x268   :  { %v302_v48 = vmax.f32 %v297_v43, 0.0  ;;  %v423_v49 = vpop.f32.mrb[3].mxu1 }
 0x26a   :  { %v310_v51 = vmul.f32 %v364_v46, %v302_v48 }
 0x26c   :  { %v319_v52 = vadd.f32 %v318_v50, %v310_v51 }
 0x26e   :  { %320 = vadd.xlane.f32.xlu1 %v319_v52 }
 0x2fb   :  { %v321_v55 = vpop.xlane.xlu1 %320 }
 0x2fc   :  { %v326_v56 = vrot.slane %v321_v55, %v325_v54 }
 0x2fe   :  { %329 = vst.msk [vmem:[#allocation7] sm:$0x1] %vm328_vm4, %v326_v56 }
 0x2ff   :  { %509 = shalt.err (!%p506_p6)
}
 0x300   :  { %s510_s13 = scalar_lea.hbm %s656_s7, 16 }
 0x301   :  { %p511_p7 = scmp.ne.s32.totalorder %s656_s7, %s510_s13  ;;  %p514_p8 = scmp.lt.u32.totalorder %s510_s13, %s656_s7 }
 0x303   :  { %p516_p9 = pnand %p514_p8, %p511_p7 }
 0x305   :  { %519 = shalt.err (!%p516_p9)
}
 0x306   :  { %339 = dma.vmem_to_hbm [thread:$0]  %s337_s10, 16, %s656_s7, [#allocation4]  }
 0x307   :  { %524 = dma.done.wait [#allocation4], 16  }
 0x308   :  { %525 = vsyncadd [#allocation4], 4294967280 }
 0x309   :  { %343 = vsyncpa [#allocation3], 1 }
 0x30a   :  { %344 = vsyncpa [#allocation6], 1 }
 0x30b   :  { %345 = vsyncpa [#allocation4], 1 }

</bundles_post_ra>
